<compile_context>
chip_gen: v6e
topology: v6e:2x2x1
jax: 0.10.0
libtpu: 0.0.40
codegen_flags: <defaults>
</compile_context>

<pallas_src>
import jax
import jax.numpy as jnp
from jax.experimental import pallas as pl
from jax.experimental.pallas import tpu as pltpu


def _gelu_tanh(x):
    # Matches torch.nn.GELU(approximate='tanh')
    c = 0.7978845608028654  # sqrt(2/pi)
    return 0.5 * x * (1.0 + jnp.tanh(c * (x + 0.044715 * x * x * x)))


def _round_up(x, m):
    return (x + m - 1) // m * m


def _vmem_budget():
    # ~96 MiB on 128-MiB chips (v5e/v6e), ~44 MiB on 64-MiB chips (v7x).
    cap = 128 * 1024 * 1024
    try:
        cap = int(pltpu.get_tpu_info().vmem_capacity_bytes)
    except Exception:
        pass
    return min((cap * 3) // 4, cap - 20 * 1024 * 1024)


# --------------------------------------------------------------------------
# Kernels
# --------------------------------------------------------------------------

def _mlp_kernel_resident(x_ref, wfc_ref, bfc_ref, wproj_ref, bproj_ref, o_ref):
    """Whole-H weights resident in VMEM; one row tile per grid step."""
    h = jnp.dot(x_ref[...], wfc_ref[...], preferred_element_type=jnp.float32)
    h = h + bfc_ref[...].astype(jnp.float32)
    g = _gelu_tanh(h)                                   # f32 on VPU/EUP
    y = jnp.dot(g.astype(wproj_ref.dtype), wproj_ref[...],
                preferred_element_type=jnp.float32)
    o_ref[...] = (y + bproj_ref[...].astype(jnp.float32)).astype(o_ref.dtype)


def _mlp_kernel_tiled(x_ref, wfc_ref, bfc_ref, wproj_ref, bproj_ref, o_ref,
                      acc_ref):
    """Hidden dim tiled as reduction axis; f32 VMEM accumulator."""
    h_idx = pl.program_id(1)

    @pl.when(h_idx == 0)
    def _init():
        acc_ref[...] = jnp.zeros_like(acc_ref)

    h = jnp.dot(x_ref[...], wfc_ref[...], preferred_element_type=jnp.float32)
    h = h + bfc_ref[...].astype(jnp.float32)
    g = _gelu_tanh(h)
    acc_ref[...] += jnp.dot(g.astype(wproj_ref.dtype), wproj_ref[...],
                            preferred_element_type=jnp.float32)

    @pl.when(h_idx == pl.num_programs(1) - 1)
    def _finalize():
        o_ref[...] = (acc_ref[...]
                      + bproj_ref[...].astype(jnp.float32)).astype(o_ref.dtype)


# --------------------------------------------------------------------------
# Tile chooser
# --------------------------------------------------------------------------

def _choose_config(M, C, H, compute_itemsize, out_itemsize, budget):
    align_m = 16 if compute_itemsize < 4 else 8
    m_cap = _round_up(M, align_m)

    def est(tm, th, multi):
        b = 2 * tm * C * compute_itemsize        # x block (double-buffered)
        b += 2 * C * th * compute_itemsize       # W_fc block
        b += 2 * th * C * compute_itemsize       # W_proj block
        b += 2 * tm * C * out_itemsize           # output block
        b += 2 * (th + C) * 4                    # bias blocks
        b += (3 * tm * th * 4) // 2              # f32 h / GELU temporaries (~1.5x)
        if multi:
            b += tm * C * 4                      # f32 accumulator scratch
        return b

    tm_cands = []
    for t in (1024, 512, 256, 128, 64, 32, 16, 8):
        t = max(_round_up(min(t, m_cap), align_m), align_m)
        if t not in tm_cands:
            tm_cands.append(t)

    # Preferred: full-H weights resident in VMEM. The weight block index is
    # constant over the whole grid, so weights stream from HBM exactly once.
    for tm in tm_cands:
        if est(tm, H, False) <= budget:
            if tm >= m_cap and M >= 512:
                # Keep >=2 row blocks so the second TensorCore (v7x megacore)
                # has work; essentially free on single-core chips.
                tm = _round_up((M + 1) // 2, align_m)
            return tm, H, False

    # Fallback: tile the hidden (reduction) dim with 256-aligned blocks and the
    # largest row tile that fits (arithmetic intensity vs. re-streamed weights).
    for tm in tm_cands:
        th = min(_round_up(H, 256), 8192)
        while th >= 256:
            if est(tm, th, True) <= budget:
                return tm, th, True
            th -= 256
    return tm_cands[-1], 256, True   # last resort (tiny tiles)


# --------------------------------------------------------------------------
# Wrapper
# --------------------------------------------------------------------------

def mlp_pallas(x, w_fc, b_fc, w_proj, b_proj, *, compute_dtype=jnp.bfloat16,
               row_tile=None, hidden_tile=None, vmem_limit_bytes=None):
    """GELU_tanh(x @ w_fc + b_fc) @ w_proj + b_proj.

    x: (B, T, C); w_fc: (C, H); b_fc: (H,); w_proj: (H, C); b_proj: (C,)
    (weights pre-transposed to (in, out), i.e. PyTorch weight.T).
    """
    B, T, C = x.shape
    Cin, H = w_fc.shape
    assert Cin == C and w_proj.shape == (H, C)
    assert b_fc.shape == (H,) and b_proj.shape == (C,)
    M = B * T
    out_dtype = x.dtype

    compute_dtype = jnp.dtype(x.dtype if compute_dtype is None else compute_dtype)
    align_m = 16 if compute_dtype.itemsize < 4 else 8

    if vmem_limit_bytes is None:
        vmem_limit_bytes = _vmem_budget()

    tm, th, multi = _choose_config(M, C, H, compute_dtype.itemsize,
                                   jnp.dtype(out_dtype).itemsize,
                                   vmem_limit_bytes)
    if row_tile is not None:
        tm = max(_round_up(min(row_tile, _round_up(M, align_m)), align_m), align_m)
    if hidden_tile is not None:
        th = min(max(_round_up(hidden_tile, 128), 128), _round_up(H, 128))
        multi = th < H
        if not multi:
            th = H

    M_pad = _round_up(M, align_m)
    n_row = pl.cdiv(M_pad, tm)

    x2 = x.reshape(M, C).astype(compute_dtype)
    if M_pad != M:
        x2 = jnp.pad(x2, ((0, M_pad - M), (0, 0)))
    wfc = w_fc.astype(compute_dtype)
    wproj = w_proj.astype(compute_dtype)
    bfc2 = b_fc.reshape(1, H)
    bproj2 = b_proj.reshape(1, C)

    itemsize = compute_dtype.itemsize
    weight_bytes = (wfc.size + wproj.size) * itemsize
    cost = pl.CostEstimate(
        flops=4 * M * C * H,                    # two matmuls, 2*M*C*H each
        transcendentals=M * H,                  # one tanh per hidden activation
        bytes_accessed=(x2.size * itemsize
                        + M_pad * C * jnp.dtype(out_dtype).itemsize
                        + weight_bytes * (n_row if multi else 1)
                        + (bfc2.size + bproj2.size) * 4),
    )

    if not multi:
        grid_spec = pltpu.PrefetchScalarGridSpec(
            num_scalar_prefetch=0,
            grid=(n_row,),
            in_specs=[
                pl.BlockSpec((tm, C), lambda i: (i, 0)),   # x rows
                pl.BlockSpec((C, H), lambda i: (0, 0)),    # W_fc (resident)
                pl.BlockSpec((1, H), lambda i: (0, 0)),    # b_fc
                pl.BlockSpec((H, C), lambda i: (0, 0)),    # W_proj (resident)
                pl.BlockSpec((1, C), lambda i: (0, 0)),    # b_proj
            ],
            out_specs=pl.BlockSpec((tm, C), lambda i: (i, 0)),
        )
        kernel = _mlp_kernel_resident
        dims = ("parallel",)
    else:
        H_pad = _round_up(H, th)
        if H_pad != H:                          # zero-pad: exact (zero contrib)
            wfc = jnp.pad(wfc, ((0, 0), (0, H_pad - H)))
            bfc2 = jnp.pad(bfc2, ((0, 0), (0, H_pad - H)))
            wproj = jnp.pad(wproj, ((0, H_pad - H), (0, 0)))
        n_h = H_pad // th
        grid_spec = pltpu.PrefetchScalarGridSpec(
            num_scalar_prefetch=0,
            grid=(n_row, n_h),
            in_specs=[
                pl.BlockSpec((tm, C), lambda i, h: (i, 0)),    # x rows
                pl.BlockSpec((C, th), lambda i, h: (0, h)),    # W_fc cols
                pl.BlockSpec((1, th), lambda i, h: (0, h)),    # b_fc slice
                pl.BlockSpec((th, C), lambda i, h: (h, 0)),    # W_proj rows
                pl.BlockSpec((1, C), lambda i, h: (0, 0)),     # b_proj
            ],
            out_specs=pl.BlockSpec((tm, C), lambda i, h: (i, 0)),
            scratch_shapes=[pltpu.VMEM((tm, C), jnp.float32)],  # f32 accumulator
        )
        kernel = _mlp_kernel_tiled
        dims = ("parallel", "arbitrary")

    out = pl.pallas_call(
        kernel,
        out_shape=jax.ShapeDtypeStruct((M_pad, C), out_dtype),
        grid_spec=grid_spec,
        compiler_params=pltpu.CompilerParams(
            dimension_semantics=dims,
            vmem_limit_bytes=int(vmem_limit_bytes),
        ),
        cost_estimate=cost,
    )(x2, wfc, bfc2, wproj, bproj2)

    return out[:M].reshape(B, T, C)


# --------------------------------------------------------------------------
# Reference + test harness
# --------------------------------------------------------------------------

def mlp_reference(x, w_fc, b_fc, w_proj, b_proj):
    xf = x.astype(jnp.float32)
    h = jnp.einsum("btc,ch->bth", xf, w_fc.astype(jnp.float32))
    h = h + b_fc.astype(jnp.float32)
    g = _gelu_tanh(h)
    y = jnp.einsum("bth,hc->btc", g, w_proj.astype(jnp.float32))
    return y + b_proj.astype(jnp.float32)


def _make_inputs(key, B, T, C, dtype=jnp.float32):
    H = 4 * C
    kx, k1, k2, k3, k4 = jax.random.split(key, 5)
    x = jax.random.normal(kx, (B, T, C), dtype=dtype)
    # nn.Linear(n_embd, 4*n_embd): weight (4C, C); nn.Linear(4C, C): weight (C, 4C).
    w_fc_t = jax.random.normal(k1, (H, C), dtype=dtype) * 0.02
    b_fc = jax.random.normal(k2, (H,), dtype=dtype) * 0.02
    w_proj_t = jax.random.normal(k3, (C, H), dtype=dtype) * 0.02
    b_proj = jax.random.normal(k4, (C,), dtype=dtype) * 0.02
    # Pre-transpose to (in, out) so kernel does x @ W + b (== x @ W_torch.T + b).
    return x, w_fc_t.T, b_fc, w_proj_t.T, b_proj


if __name__ == "__main__":
    key = jax.random.PRNGKey(0)
    k0, k1, k2 = jax.random.split(key, 3)

    # 1) Exact f32 check (batch=2, seq=8, n_embd=32 -> hidden=128): resident-
    #    weights fast path, no hidden tiling.
    x, w_fc, b_fc, w_proj, b_proj = _make_inputs(k0, B=2, T=8, C=32,
                                                 dtype=jnp.float32)
    out = jax.block_until_ready(
        mlp_pallas(x, w_fc, b_fc, w_proj, b_proj, compute_dtype=jnp.float32))
    ref = mlp_reference(x, w_fc, b_fc, w_proj, b_proj)
    assert out.shape == x.shape
    assert jnp.allclose(out.astype(jnp.float32), ref, atol=1e-5, rtol=1e-4)

    # 2) Default bf16 MXU path with row padding (M=26 -> 32) and the tiled
    #    hidden reduction axis (H=512, th=256 -> 2 accumulation steps).
    x2, w_fc2, b_fc2, w_proj2, b_proj2 = _make_inputs(k1, B=2, T=13, C=128,
                                                      dtype=jnp.bfloat16)
    out2 = jax.block_until_ready(
        mlp_pallas(x2, w_fc2, b_fc2, w_proj2, b_proj2, hidden_tile=256))
    ref2 = mlp_reference(x2, w_fc2, b_fc2, w_proj2, b_proj2)
    assert out2.shape == x2.shape
    assert jnp.allclose(out2.astype(jnp.float32), ref2, atol=5e-3, rtol=5e-2)

    # 3) f32 check of a partial last row block (M=300, tm=128 -> 3 row blocks,
    #    last one masked) and a zero-padded hidden dim (H=384 -> 512, th=256).
    x3, w_fc3, b_fc3, w_proj3, b_proj3 = _make_inputs(k2, B=4, T=75, C=96,
                                                      dtype=jnp.float32)
    out3 = jax.block_until_ready(
        mlp_pallas(x3, w_fc3, b_fc3, w_proj3, b_proj3,
                   compute_dtype=jnp.float32, row_tile=128, hidden_tile=256))
    ref3 = mlp_reference(x3, w_fc3, b_fc3, w_proj3, b_proj3)
    assert out3.shape == x3.shape
    assert jnp.allclose(out3.astype(jnp.float32), ref3, atol=1e-5, rtol=1e-4)

    print("KERNEL_OK")
</pallas_src>

<mosaic_0001>
module attributes {stable_mosaic.version = 11 : i64} {
  func.func @_mlp_kernel_resident(%arg0: i32, %arg1: memref<16x32xf32, #tpu.memory_space<vmem>>, %arg2: memref<32x128xf32, #tpu.memory_space<vmem>>, %arg3: memref<1x128xf32, #tpu.memory_space<vmem>>, %arg4: memref<128x32xf32, #tpu.memory_space<vmem>>, %arg5: memref<1x32xf32, #tpu.memory_space<vmem>>, %arg6: memref<16x32xf32, #tpu.memory_space<vmem>>) attributes {dimension_semantics = [#tpu.dimension_semantics<parallel>], iteration_bounds = array<i64: 1>, scalar_prefetch = 0 : i64, scratch_operands = 0 : i64, tpu.core_type = #tpu.core_type<tc>, window_params = [{transform_indices = @transform_0, window_bounds = array<i64: 16, 32>}, {pipeline_mode = #tpu.pipeline_mode<synchronous>, transform_indices = @transform_1, window_bounds = array<i64: 32, 128>}, {pipeline_mode = #tpu.pipeline_mode<synchronous>, transform_indices = @transform_2, window_bounds = array<i64: 1, 128>}, {pipeline_mode = #tpu.pipeline_mode<synchronous>, transform_indices = @transform_3, window_bounds = array<i64: 128, 32>}, {pipeline_mode = #tpu.pipeline_mode<synchronous>, transform_indices = @transform_4, window_bounds = array<i64: 1, 32>}, {transform_indices = @transform_5, window_bounds = array<i64: 16, 32>}]} {
    %c0 = arith.constant 0 : index
    %c0_0 = arith.constant 0 : index
    %0 = vector.load %arg1[%c0, %c0_0] : memref<16x32xf32, #tpu.memory_space<vmem>>, vector<16x32xf32>
    %c0_1 = arith.constant 0 : index
    %c0_2 = arith.constant 0 : index
    %1 = vector.load %arg2[%c0_1, %c0_2] : memref<32x128xf32, #tpu.memory_space<vmem>>, vector<32x128xf32>
    %cst = arith.constant dense<0.000000e+00> : vector<16x128xf32>
    %2 = tpu.matmul %0, %1, %cst {dimension_numbers = #tpu.dot_dimension_numbers<[1], [0], [0], [1], [0, 0, 1, 1], [], []>} : vector<16x32xf32>, vector<32x128xf32>, vector<16x128xf32> -> vector<16x128xf32>
    %c0_3 = arith.constant 0 : index
    %c0_4 = arith.constant 0 : index
    %3 = vector.load %arg3[%c0_3, %c0_4] : memref<1x128xf32, #tpu.memory_space<vmem>>, vector<1x128xf32>
    %4 = vector.broadcast %3 : vector<1x128xf32> to vector<16x128xf32>
    %5 = arith.addf %2, %4 : vector<16x128xf32>
    %cst_5 = arith.constant 5.000000e-01 : f32
    %6 = vector.broadcast %cst_5 : f32 to vector<16x128xf32>
    %7 = arith.mulf %6, %5 : vector<16x128xf32>
    %cst_6 = arith.constant 4.471500e-02 : f32
    %8 = vector.broadcast %cst_6 : f32 to vector<16x128xf32>
    %9 = arith.mulf %8, %5 : vector<16x128xf32>
    %10 = arith.mulf %9, %5 : vector<16x128xf32>
    %11 = arith.mulf %10, %5 : vector<16x128xf32>
    %12 = arith.addf %5, %11 : vector<16x128xf32>
    %cst_7 = arith.constant 0.797884583 : f32
    %13 = vector.broadcast %cst_7 : f32 to vector<16x128xf32>
    %14 = arith.mulf %13, %12 : vector<16x128xf32>
    %15 = math.tanh %14 : vector<16x128xf32>
    %cst_8 = arith.constant 1.000000e+00 : f32
    %16 = vector.broadcast %cst_8 : f32 to vector<16x128xf32>
    %17 = arith.addf %16, %15 : vector<16x128xf32>
    %18 = arith.mulf %7, %17 : vector<16x128xf32>
    %c0_9 = arith.constant 0 : index
    %c0_10 = arith.constant 0 : index
    %19 = vector.load %arg4[%c0_9, %c0_10] : memref<128x32xf32, #tpu.memory_space<vmem>>, vector<128x32xf32>
    %cst_11 = arith.constant dense<0.000000e+00> : vector<16x32xf32>
    %20 = tpu.matmul %18, %19, %cst_11 {dimension_numbers = #tpu.dot_dimension_numbers<[1], [0], [0], [1], [0, 0, 1, 1], [], []>} : vector<16x128xf32>, vector<128x32xf32>, vector<16x32xf32> -> vector<16x32xf32>
    %c0_12 = arith.constant 0 : index
    %c0_13 = arith.constant 0 : index
    %21 = vector.load %arg5[%c0_12, %c0_13] : memref<1x32xf32, #tpu.memory_space<vmem>>, vector<1x32xf32>
    %22 = vector.broadcast %21 : vector<1x32xf32> to vector<16x32xf32>
    %23 = arith.addf %20, %22 : vector<16x32xf32>
    %c0_14 = arith.constant 0 : index
    %c0_15 = arith.constant 0 : index
    %24 = vector.load %arg6[%c0_14, %c0_15] : memref<16x32xf32, #tpu.memory_space<vmem>>, vector<16x32xf32>
    tpu.vector_store %arg6[%c0_14, %c0_15], %23 {strides = array<i32>} : memref<16x32xf32, #tpu.memory_space<vmem>>, vector<16x32xf32>,
    return
  }
  func.func @transform_0(%arg0: i32) -> (i32, i32) {
    %c0_i32 = arith.constant 0 : i32
    %c0_i32_0 = arith.constant 0 : i32
    return %arg0, %c0_i32 : i32, i32
  }
  func.func @transform_1(%arg0: i32) -> (i32, i32) {
    %c0_i32 = arith.constant 0 : i32
    %c0_i32_0 = arith.constant 0 : i32
    %c0_i32_1 = arith.constant 0 : i32
    return %c0_i32, %c0_i32_0 : i32, i32
  }
  func.func @transform_2(%arg0: i32) -> (i32, i32) {
    %c0_i32 = arith.constant 0 : i32
    %c0_i32_0 = arith.constant 0 : i32
    %c0_i32_1 = arith.constant 0 : i32
    return %c0_i32, %c0_i32_0 : i32, i32
  }
  func.func @transform_3(%arg0: i32) -> (i32, i32) {
    %c0_i32 = arith.constant 0 : i32
    %c0_i32_0 = arith.constant 0 : i32
    %c0_i32_1 = arith.constant 0 : i32
    return %c0_i32, %c0_i32_0 : i32, i32
  }
  func.func @transform_4(%arg0: i32) -> (i32, i32) {
    %c0_i32 = arith.constant 0 : i32
    %c0_i32_0 = arith.constant 0 : i32
    %c0_i32_1 = arith.constant 0 : i32
    return %c0_i32, %c0_i32_0 : i32, i32
  }
  func.func @transform_5(%arg0: i32) -> (i32, i32) {
    %c0_i32 = arith.constant 0 : i32
    %c0_i32_0 = arith.constant 0 : i32
    return %arg0, %c0_i32 : i32, i32
  }
}

</mosaic_0001>

<bundles_post_ra>
// kernel: tpu_custom_call.1
= control target key start
LH: loop header
LB: loop body
LE: loop exit
PB: predicated region body
PF: predicated region fallthrough
CT: control target
= control target key end

     0   :  { %vm34_vm0 = vcmask 261120   ;;  %s465_s0 = inlined_call_operand.vmem [shape: f32[16,32], index: 0, kind: input, shape index: {}]   ;;  %s466_s1 = inlined_call_operand.vmem [shape: f32[32,128], index: 1, kind: input, shape index: {}]   ;;  %s467_s2 = inlined_call_operand.vmem [shape: f32[1,128], index: 2, kind: input, shape index: {}]   ;;  %s468_s3 = inlined_call_operand.vmem [shape: f32[128,32], index: 3, kind: input, shape index: {}]   ;;  %s469_s4 = inlined_call_operand.vmem [shape: f32[1,32], index: 4, kind: input, shape index: {}]   ;;  %s470_s5 = inlined_call_operand.hbm [shape: f32[16,32], index: 5, kind: output, shape index: {}]  }
   0x1   :  { %v26_v0 = vld [vmem:[%s466_s1 + $0x18] sm:$0xff]  ;;  %v25_v1 = vld [vmem:[%s466_s1 + $0x10] sm:$0xff]  ;;  %v21_v2 = vld [vmem:[%s465_s0] sm:$0xff] }
   0x2   :  { %278 = vmatprep.subr.mxu0 %v26_v0  ;;  %v24_v3 = vld [vmem:[%s466_s1 + $0x8] sm:$0xff]  ;;  %286 = vmatprep.mubr.msk.f32.mxu0 %vm34_vm0, %v21_v2 }
   0x3   :  { %279 = vmatpush3.msra.mxu0 %v26_v0 }
   0x4   :  { %10 = vsyncpa [#allocation3], 0  ;;  %280 = vmatprep.subr.mxu0 %v25_v1  ;;  %v23_v4 = vld [vmem:[%s466_s1] sm:$0xff]  ;;  %v22_v5 = vld [vmem:[%s465_s0 + $0x8] sm:$0xff]  ;;  %s353_s10 = smov [#allocation2]  }
   0x5   :  { %281 = vmatpush3.msra.mxu0 %v25_v1  ;;  %v149_v6 = vld [vmem:[%s468_s3 + $0x78] sm:$0xff]  ;;  %v148_v7 = vld [vmem:[%s468_s3 + $0x70] sm:$0xff]  ;;  %v147_v8 = vld [vmem:[%s468_s3 + $0x68] sm:$0xff]  ;;  %s239_s11 = sshll.u32 %s353_s10, 4  ;;  %s240_s11 = int_to_ptr.vmem [resolvable:$true] %s239_s11 }
   0x6   :  { %282 = vmatprep.subr.mxu0 %v24_v3  ;;  %289 = vmatprep.subr.mxu1 %v149_v6  ;;  %v146_v9 = vld [vmem:[%s468_s3 + $0x60] sm:$0xff]  ;;  %v145_v10 = vld [vmem:[%s468_s3 + $0x58] sm:$0xff]  ;;  %v144_v11 = vld [vmem:[%s468_s3 + $0x50] sm:$0xff]  ;;  %s331_s12 = scalar_lea.vmem %s240_s11, 256  ;;  %p336_p1 = scmp.lt.s32.totalorder %s240_s11, %s240_s11 }
   0x7   :  { %283 = vmatpush3.msra.mxu0 %v24_v3  ;;  %290 = vmatpush3.msra.mxu1 %v149_v6  ;;  %v143_v12 = vld [vmem:[%s468_s3 + $0x48] sm:$0xff]  ;;  %v142_v13 = vld [vmem:[%s468_s3 + $0x40] sm:$0xff]  ;;  %v141_v14 = vld [vmem:[%s468_s3 + $0x38] sm:$0xff]  ;;  %p332_p0 = scmp.ne.s32.totalorder %s240_s11, %s331_s12  ;;  %p337_p2 = scmp.lt.s32.totalorder %s331_s12, %s331_s12 }
   0x8   :  { %284 = vmatprep.subr.mxu0 %v23_v4  ;;  %291 = vmatprep.subr.mxu1 %v148_v7  ;;  %v140_v15 = vld [vmem:[%s468_s3 + $0x30] sm:$0xff]  ;;  %v139_v16 = vld [vmem:[%s468_s3 + $0x28] sm:$0xff]  ;;  %v138_v17 = vld [vmem:[%s468_s3 + $0x20] sm:$0xff] }
   0x9   :  { %285 = vmatpush3.msra.mxu0 %v23_v4  ;;  %292 = vmatpush3.msra.mxu1 %v148_v7  ;;  %v137_v18 = vld [vmem:[%s468_s3 + $0x18] sm:$0xff]  ;;  %v136_v19 = vld [vmem:[%s468_s3 + $0x10] sm:$0xff]  ;;  %v135_v20 = vld [vmem:[%s468_s3 + $0x8] sm:$0xff]  ;;  %p338_p3 = por %p337_p2, %p336_p1 }
   0xa   :  { %287 = vmatmul.mubr.msk.f32.vlgmr.msra.gmra.mxu0 %vm34_vm0, %v22_v5  ;;  %293 = vmatprep.subr.mxu1 %v147_v8  ;;  %v134_v21 = vld [vmem:[%s468_s3] sm:$0xff] }
   0xb   :  { %294 = vmatpush3.msra.mxu1 %v147_v8  ;;  %v250_v22 = vld [vmem:[%s467_s2] ss:$0 sm:$0xff]  ;;  %p339_p4 = pnand %p338_p3, %p332_p0 }
   0xc   :  { %295 = vmatprep.subr.mxu1 %v146_v9  ;;  %v253_v45 = vld [vmem:[%s469_s4] ss:$0 sm:$0xff] }
   0xd   :  { %296 = vmatpush3.msra.mxu1 %v146_v9 }
   0xe   :  { %297 = vmatprep.subr.mxu1 %v145_v10 }
   0xf   :  { %298 = vmatpush3.msra.mxu1 %v145_v10 }
  0x10   :  { %299 = vmatprep.subr.mxu1 %v144_v11 }
  0x11   :  { %300 = vmatpush3.msra.mxu1 %v144_v11 }
  0x12   :  { %301 = vmatprep.subr.mxu1 %v143_v12 }
  0x13   :  { %302 = vmatpush3.msra.mxu1 %v143_v12 }
  0x14   :  { %303 = vmatprep.subr.mxu1 %v142_v13 }
  0x15   :  { %304 = vmatpush3.msra.mxu1 %v142_v13 }
  0x16   :  { %305 = vmatprep.subr.mxu1 %v141_v14 }
  0x17   :  { %306 = vmatpush3.msra.mxu1 %v141_v14 }
  0x18   :  { %307 = vmatprep.subr.mxu1 %v140_v15 }
  0x19   :  { %308 = vmatpush3.msra.mxu1 %v140_v15 }
  0x1a   :  { %309 = vmatprep.subr.mxu1 %v139_v16 }
  0x1b   :  { %310 = vmatpush3.msra.mxu1 %v139_v16 }
  0x1c   :  { %311 = vmatprep.subr.mxu1 %v138_v17 }
  0x1d   :  { %312 = vmatpush3.msra.mxu1 %v138_v17 }
  0x1e   :  { %313 = vmatprep.subr.mxu1 %v137_v18 }
  0x1f   :  { %314 = vmatpush3.msra.mxu1 %v137_v18 }
  0x20   :  { %315 = vmatprep.subr.mxu1 %v136_v19 }
  0x21   :  { %316 = vmatpush3.msra.mxu1 %v136_v19 }
  0x22   :  { %317 = vmatprep.subr.mxu1 %v135_v20 }
  0x23   :  { %318 = vmatpush3.msra.mxu1 %v135_v20 }
  0x24   :  { %319 = vmatprep.subr.mxu1 %v134_v21 }
  0x25   :  { %320 = vmatpush3.msra.mxu1 %v134_v21 }
  0xca   :  { %v288_v23 = vpop.f32.mrf.mxu0 }
  0xcb   :  { %v113_v24 = vadd.f32 %v288_v23, %v250_v22 }
  0xcc   :  { %v107_v25 = vpop.f32.mrf.mxu0 }
  0xcd   :  { %v119_v26 = vmul.f32 0.044715, %v113_v24  ;;  %v108_v27 = vadd.f32 %v250_v22, %v107_v25  ;;  %v117_v42 = vmul.f32 0.5, %v113_v24 }
  0xcf   :  { %v121_v28 = vmul.f32 %v119_v26, %v113_v24  ;;  %v118_v29 = vmul.f32 0.044715, %v108_v27  ;;  %v116_v40 = vmul.f32 0.5, %v108_v27 }
  0xd1   :  { %v120_v30 = vmul.f32 %v118_v29, %v108_v27  ;;  %v123_v31 = vmul.f32 %v121_v28, %v113_v24 }
  0xd3   :  { %v122_v32 = vmul.f32 %v120_v30, %v108_v27  ;;  %v125_v33 = vadd.f32 %v123_v31, %v113_v24 }
  0xd5   :  { %v124_v34 = vadd.f32 %v122_v32, %v108_v27  ;;  %v127_v35 = vmul.f32 0.7978846, %v125_v33 }
  0xd7   :  { %v126_v36 = vmul.f32 0.7978846, %v124_v34  ;;  %327 = vtanh.f32 %v127_v35 }
  0xd9   :  { %329 = vtanh.f32 %v126_v36 }
  0xe4   :  { %v328_v37 = vpop.eup %327 }
  0xe5   :  { %v131_v39 = vadd.f32 1.0, %v328_v37 }
  0xe6   :  { %v330_v38 = vpop.eup %329 }
  0xe7   :  { %v130_v41 = vadd.f32 1.0, %v330_v38  ;;  %v133_v44 = vmul.f32 %v131_v39, %v117_v42 }
  0xe9   :  { %v132_v43 = vmul.f32 %v130_v41, %v116_v40 }
  0xeb   :  { %321 = vmatprep.mubr.f32.mxu1 %v132_v43 }
  0xec   :  { %322 = vmatmul.mubr.f32.vlgmr.msra.gmra.mxu1 %v133_v44 }
 0x1ac   :  { %v323_v46 = vpop.f32.mrf.mxu1 }
 0x1ad   :  { %v229_v47 = vadd.f32 %v323_v46, %v253_v45 }
 0x1ae   :  { %v223_v48 = vpop.f32.mrf.mxu1 }
 0x1af   :  { %233 = vst.msk [vmem:[#allocation2 + $0x8] sm:$0xff] %vm34_vm0, %v229_v47  ;;  %v224_v49 = vadd.f32 %v253_v45, %v223_v48 }
 0x1b1   :  { %232 = vst.msk [vmem:[#allocation2] sm:$0xff] %vm34_vm0, %v224_v49 }
 0x1b2   :  { %342 = shalt.err (!%p339_p4)
}
 0x1b3   :  { %s354_s13 = smov 128   ;;  %s355_s4 = smov 8  }
 0x1b4   :  { %245 = dma.vmem_to_hbm [thread:$0]  %s240_s11, 256, %s470_s5, [#allocation3], %s354_s13, %s354_s13, %s355_s4  }
 0x1b5   :  { %351 = dma.done.wait [#allocation3], 256  }
 0x1b6   :  { %352 = vsyncadd [#allocation3], 4294967040 }
 0x1b7   :  { %249 = vsyncpa [#allocation3], 1 }

</bundles_post_ra>
